<compile_context>
chip_gen: v5e
topology: v5e:2x2
jax: 0.10.0
libtpu: 0.0.40
codegen_flags: <defaults>
</compile_context>

<pallas_src>
import functools

import jax
import jax.numpy as jnp
from jax.experimental import pallas as pl
from jax.experimental.pallas import tpu as pltpu

HIDDEN = 16  # nn.Linear(input_size, 16)
OUT = 1      # nn.Linear(16, 1)

TARGET_X_BUF_BYTES = 8 * 1024 * 1024   # per pipeline buffer, lane-padded
MIN_TILES = 4                          # keep >= 4 grid steps on large batches
VMEM_LIMIT_BYTES = 48 * 1024 * 1024    # <= v7x 64 MiB/TC, > v5e/v6e defaults


def _round_up(n, m):
    return ((n + m - 1) // m) * m


def _choose_tile(batch, d):
    """Batch-tile rows per grid step, sized against the VMEM budget."""
    lanes = _round_up(max(d, 1), 128)          # VMEM lane padding of the x tile
    tb = TARGET_X_BUF_BYTES // (4 * lanes)
    if batch >= MIN_TILES * 128:
        # Keep >= MIN_TILES grid steps for the 2-TC split + DMA/compute overlap.
        tb = min(tb, (batch + MIN_TILES - 1) // MIN_TILES)
    tb = _round_up(max(tb, 128), 128)          # multiple of 128 -> lane-dense out
    if tb >= batch:
        return batch                           # single exact tile (small batch)
    return tb


def _slmp_kernel(x_ref, w1_ref, b1_ref, w2_ref, b2_ref, o_ref, *,
                 batch, tile_b, mxu_precision):
    # x:(tb,D)  w1:(16,D) (PyTorch out,in layout)  b1:(16,1)  w2:(16,1)
    # b2:(1,1)  o:(1,tb) lane-dense row.
    i = pl.program_id(0)

    # fc1, transposed: h^T = w1 . x^T -> (16, tb). Contracting both last dims
    # is the standard MXU A.B^T pattern; the result is lane-dense over batch.
    ht = jax.lax.dot_general(
        w1_ref[...], x_ref[...],
        dimension_numbers=(((1,), (1,)), ((), ())),
        preferred_element_type=jnp.float32,
        precision=mxu_precision,
    )
    ht = jnp.maximum(ht + b1_ref[...], 0.0)                     # + b1, ReLU

    # fc2 (K=16, N=1): VPU multiply + 16-wide sublane reduction (XLU), keeps
    # lanes, instead of a second mostly-idle MXU pass.
    z = jnp.sum(ht * w2_ref[...], axis=0, keepdims=True) + b2_ref[...]   # (1,tb)

    # Sigmoid with an exact divide (fp32 parity with the PyTorch reference).
    out = 1.0 / (1.0 + jnp.exp(-z))

    # The final tile may read past the real batch (ragged block, no wrapper
    # pad): mask those columns so the discarded region is deterministic.
    col = jax.lax.broadcasted_iota(jnp.int32, z.shape, dimension=1)
    valid = (i * tile_b + col) < batch
    o_ref[...] = jnp.where(valid, out, 0.0)


def slmp_forward(x, w1, b1, w2, b2, *, stream_x_bf16=False):
    """SLMP forward. Weights use the PyTorch nn.Linear (out, in) layout:
       x:(B,D) f32, w1:(16,D), b1:(16,), w2:(1,16), b2:(1,). Returns (B,1) f32."""
    batch, d = x.shape
    assert w1.shape == (HIDDEN, d)
    assert w2.shape == (OUT, HIDDEN)

    if stream_x_bf16 and x.dtype == jnp.float32:
        # TODO(synk): casting here still round-trips x once through HBM; pass
        # bf16 activations in directly to realize the full ~2x read saving.
        x = x.astype(jnp.bfloat16)

    w1_k = w1.astype(x.dtype)                              # MXU operands match
    b1_col = b1.reshape(HIDDEN, 1).astype(jnp.float32)
    w2_col = w2.reshape(HIDDEN, 1).astype(jnp.float32)
    b2_2d = b2.reshape(1, OUT).astype(jnp.float32)

    tb = _choose_tile(batch, d)
    num_tiles = pl.cdiv(batch, tb)
    total_cols = num_tiles * tb

    mxu_precision = (jax.lax.Precision.HIGHEST
                     if x.dtype == jnp.float32 else jax.lax.Precision.DEFAULT)
    kernel = functools.partial(
        _slmp_kernel, batch=batch, tile_b=tb, mxu_precision=mxu_precision)

    itemsize = jnp.dtype(x.dtype).itemsize
    flops = 2 * batch * d * HIDDEN + 6 * batch * HIDDEN + 4 * batch
    bytes_accessed = (batch * d * itemsize + total_cols * 4
                      + HIDDEN * d * itemsize + (2 * HIDDEN + 1) * 4)

    out_row = pl.pallas_call(
        kernel,
        out_shape=jax.ShapeDtypeStruct((1, total_cols), jnp.float32),
        grid_spec=pltpu.PrefetchScalarGridSpec(
            num_scalar_prefetch=0,
            grid=(num_tiles,),
            in_specs=[
                # x: tiled over batch -> automatic double-buffered DMA of the
                # dominant HBM traffic; final block may be ragged (no pad).
                pl.BlockSpec((tb, d), lambda i: (i, 0)),
                # Weights / biases: constant index map -> stay VMEM-resident.
                pl.BlockSpec((HIDDEN, d), lambda i: (0, 0)),
                pl.BlockSpec((HIDDEN, 1), lambda i: (0, 0)),
                pl.BlockSpec((HIDDEN, 1), lambda i: (0, 0)),
                pl.BlockSpec((1, OUT), lambda i: (0, 0)),
            ],
            # Lane-dense (1, tb) output row per step -> unmasked stores.
            out_specs=pl.BlockSpec((1, tb), lambda i: (0, i)),
        ),
        compiler_params=pltpu.CompilerParams(
            dimension_semantics=("parallel",),   # batch tiles are independent
            vmem_limit_bytes=VMEM_LIMIT_BYTES,
        ),
        cost_estimate=pl.CostEstimate(
            flops=flops,
            transcendentals=batch,               # one exp per row
            bytes_accessed=bytes_accessed,
        ),
    )(x, w1_k, b1_col, w2_col, b2_2d)

    # (1, num_tiles*tb) row -> (B, 1) column; the slice is tiny (B*4 bytes).
    return out_row[0, :batch].reshape(batch, OUT)


def init_params(key, input_size):
    # PyTorch default Linear init: U(-1/sqrt(fan_in), 1/sqrt(fan_in)),
    # weights stored in PyTorch (out_features, in_features) layout.
    k1, k2, k3, k4 = jax.random.split(key, 4)
    bound1 = 1.0 / jnp.sqrt(jnp.float32(input_size))
    bound2 = 1.0 / jnp.sqrt(jnp.float32(HIDDEN))
    w1 = jax.random.uniform(k1, (HIDDEN, input_size), jnp.float32, -bound1, bound1)
    b1 = jax.random.uniform(k2, (HIDDEN,), jnp.float32, -bound1, bound1)
    w2 = jax.random.uniform(k3, (OUT, HIDDEN), jnp.float32, -bound2, bound2)
    b2 = jax.random.uniform(k4, (OUT,), jnp.float32, -bound2, bound2)
    return w1, b1, w2, b2


def reference_forward(x, w1, b1, w2, b2):
    xf = x.astype(jnp.float32)
    h = jnp.maximum(
        jnp.dot(xf, w1.T, precision=jax.lax.Precision.HIGHEST) + b1, 0.0)
    z = jnp.dot(h, w2.T, precision=jax.lax.Precision.HIGHEST) + b2
    return 1.0 / (1.0 + jnp.exp(-z))


if __name__ == "__main__":
    key = jax.random.PRNGKey(0)
    kx, kp, kx2 = jax.random.split(key, 3)

    # Small demo shapes implied by the module (fc1: input_size -> 16).
    batch, input_size = 8, 32
    x = jax.random.normal(kx, (batch, input_size), jnp.float32)
    w1, b1, w2, b2 = init_params(kp, input_size)

    out = jax.block_until_ready(slmp_forward(x, w1, b1, w2, b2))
    ref = reference_forward(x, w1, b1, w2, b2)
    assert out.shape == (batch, OUT)
    assert jnp.allclose(out, ref, atol=1e-5, rtol=1e-5)

    # Multi-tile path with a ragged final block (no wrapper-side padding).
    batch2 = 1037
    x2 = jax.random.normal(kx2, (batch2, input_size), jnp.float32)
    out2 = jax.block_until_ready(slmp_forward(x2, w1, b1, w2, b2))
    ref2 = reference_forward(x2, w1, b1, w2, b2)
    assert out2.shape == (batch2, OUT)
    assert jnp.allclose(out2, ref2, atol=1e-5, rtol=1e-5)

    # Optional bf16-streamed x path (approximate; halves the dominant HBM read).
    out3 = jax.block_until_ready(
        slmp_forward(x2, w1, b1, w2, b2, stream_x_bf16=True))
    assert out3.shape == (batch2, OUT)
    assert jnp.allclose(out3, ref2, atol=3e-2)

    print("KERNEL_OK")
</pallas_src>

<mosaic_0001>
module attributes {stable_mosaic.version = 11 : i64} {
  func.func @_slmp_kernel(%arg0: i32, %arg1: memref<8x32xf32, #tpu.memory_space<vmem>>, %arg2: memref<16x32xf32, #tpu.memory_space<vmem>>, %arg3: memref<16x1xf32, #tpu.memory_space<vmem>>, %arg4: memref<16x1xf32, #tpu.memory_space<vmem>>, %arg5: memref<1x1xf32, #tpu.memory_space<vmem>>, %arg6: memref<1x8xf32, #tpu.memory_space<vmem>>) attributes {dimension_semantics = [#tpu.dimension_semantics<parallel>], iteration_bounds = array<i64: 1>, scalar_prefetch = 0 : i64, scratch_operands = 0 : i64, tpu.core_type = #tpu.core_type<tc>, window_params = [{transform_indices = @transform_0, window_bounds = array<i64: 8, 32>}, {pipeline_mode = #tpu.pipeline_mode<synchronous>, transform_indices = @transform_1, window_bounds = array<i64: 16, 32>}, {pipeline_mode = #tpu.pipeline_mode<synchronous>, transform_indices = @transform_2, window_bounds = array<i64: 16, 1>}, {pipeline_mode = #tpu.pipeline_mode<synchronous>, transform_indices = @transform_3, window_bounds = array<i64: 16, 1>}, {pipeline_mode = #tpu.pipeline_mode<synchronous>, transform_indices = @transform_4, window_bounds = array<i64: 1, 1>}, {transform_indices = @transform_5, window_bounds = array<i64: 1, 8>}]} {
    %c0 = arith.constant 0 : index
    %c0_0 = arith.constant 0 : index
    %0 = vector.load %arg2[%c0, %c0_0] : memref<16x32xf32, #tpu.memory_space<vmem>>, vector<16x32xf32>
    %c0_1 = arith.constant 0 : index
    %c0_2 = arith.constant 0 : index
    %1 = vector.load %arg1[%c0_1, %c0_2] : memref<8x32xf32, #tpu.memory_space<vmem>>, vector<8x32xf32>
    %cst = arith.constant dense<0.000000e+00> : vector<16x8xf32>
    %2 = tpu.matmul %0, %1, %cst {dimension_numbers = #tpu.dot_dimension_numbers<[1], [1], [0], [0], [0, 0, 1, 0], [], []>, precision = #tpu.contract_precision<fp32>} : vector<16x32xf32>, vector<8x32xf32>, vector<16x8xf32> -> vector<16x8xf32>
    %c0_3 = arith.constant 0 : index
    %c0_4 = arith.constant 0 : index
    %3 = vector.load %arg3[%c0_3, %c0_4] : memref<16x1xf32, #tpu.memory_space<vmem>>, vector<16x1xf32>
    %4 = vector.broadcast %3 : vector<16x1xf32> to vector<16x8xf32>
    %5 = arith.addf %2, %4 : vector<16x8xf32>
    %cst_5 = arith.constant 0.000000e+00 : f32
    %6 = vector.broadcast %cst_5 : f32 to vector<16x8xf32>
    %7 = arith.maximumf %5, %6 : vector<16x8xf32>
    %c0_6 = arith.constant 0 : index
    %c0_7 = arith.constant 0 : index
    %8 = vector.load %arg4[%c0_6, %c0_7] : memref<16x1xf32, #tpu.memory_space<vmem>>, vector<16x1xf32>
    %9 = vector.broadcast %8 : vector<16x1xf32> to vector<16x8xf32>
    %10 = arith.mulf %7, %9 : vector<16x8xf32>
    %cst_8 = arith.constant dense<0.000000e+00> : vector<8xf32>
    %11 = vector.multi_reduction <add>, %10, %cst_8 [0] : vector<16x8xf32> to vector<8xf32>
    %12 = vector.shape_cast %11 : vector<8xf32> to vector<1x8xf32>
    %c0_9 = arith.constant 0 : index
    %c0_10 = arith.constant 0 : index
    %13 = vector.load %arg5[%c0_9, %c0_10] : memref<1x1xf32, #tpu.memory_space<vmem>>, vector<1x1xf32>
    %14 = vector.broadcast %13 : vector<1x1xf32> to vector<1x8xf32>
    %15 = arith.addf %12, %14 : vector<1x8xf32>
    %cst_11 = arith.constant 0.000000e+00 : f32
    %16 = vector.broadcast %cst_11 : f32 to vector<1x8xf32>
    %17 = arith.subf %16, %15 : vector<1x8xf32>
    %18 = math.exp %17 : vector<1x8xf32>
    %cst_12 = arith.constant 1.000000e+00 : f32
    %19 = vector.broadcast %cst_12 : f32 to vector<1x8xf32>
    %20 = arith.addf %19, %18 : vector<1x8xf32>
    %cst_13 = arith.constant 1.000000e+00 : f32
    %21 = vector.broadcast %cst_13 : f32 to vector<1x8xf32>
    %22 = arith.divf %21, %20 : vector<1x8xf32>
    %23 = tpu.iota {dimensions = array<i32: 1>} : vector<1x8xi32>
    %c8_i32 = arith.constant 8 : i32
    %24 = arith.muli %arg0, %c8_i32 : i32
    %25 = vector.broadcast %24 : i32 to vector<1x8xi32>
    %26 = arith.addi %25, %23 : vector<1x8xi32>
    %c8_i32_14 = arith.constant 8 : i32
    %27 = vector.broadcast %c8_i32_14 : i32 to vector<1x8xi32>
    %28 = arith.cmpi slt, %26, %27 : vector<1x8xi32>
    %cst_15 = arith.constant 0.000000e+00 : f32
    %29 = vector.broadcast %cst_15 : f32 to vector<1x8xf32>
    %30 = arith.select %28, %22, %29 : vector<1x8xi1>, vector<1x8xf32>
    %c0_16 = arith.constant 0 : index
    %c0_17 = arith.constant 0 : index
    %31 = vector.load %arg6[%c0_16, %c0_17] : memref<1x8xf32, #tpu.memory_space<vmem>>, vector<1x8xf32>
    tpu.vector_store %arg6[%c0_16, %c0_17], %30 {strides = array<i32>} : memref<1x8xf32, #tpu.memory_space<vmem>>, vector<1x8xf32>,
    return
  }
  func.func @transform_0(%arg0: i32) -> (i32, i32) {
    %c0_i32 = arith.constant 0 : i32
    %c0_i32_0 = arith.constant 0 : i32
    return %arg0, %c0_i32 : i32, i32
  }
  func.func @transform_1(%arg0: i32) -> (i32, i32) {
    %c0_i32 = arith.constant 0 : i32
    %c0_i32_0 = arith.constant 0 : i32
    %c0_i32_1 = arith.constant 0 : i32
    return %c0_i32, %c0_i32_0 : i32, i32
  }
  func.func @transform_2(%arg0: i32) -> (i32, i32) {
    %c0_i32 = arith.constant 0 : i32
    %c0_i32_0 = arith.constant 0 : i32
    %c0_i32_1 = arith.constant 0 : i32
    return %c0_i32, %c0_i32_0 : i32, i32
  }
  func.func @transform_3(%arg0: i32) -> (i32, i32) {
    %c0_i32 = arith.constant 0 : i32
    %c0_i32_0 = arith.constant 0 : i32
    %c0_i32_1 = arith.constant 0 : i32
    return %c0_i32, %c0_i32_0 : i32, i32
  }
  func.func @transform_4(%arg0: i32) -> (i32, i32) {
    %c0_i32 = arith.constant 0 : i32
    %c0_i32_0 = arith.constant 0 : i32
    %c0_i32_1 = arith.constant 0 : i32
    return %c0_i32, %c0_i32_0 : i32, i32
  }
  func.func @transform_5(%arg0: i32) -> (i32, i32) {
    %c0_i32 = arith.constant 0 : i32
    %c0_i32_0 = arith.constant 0 : i32
    return %c0_i32, %arg0 : i32, i32
  }
}

</mosaic_0001>

<bundles_post_ra>
// kernel: tpu_custom_call.1
= control target key start
LH: loop header
LB: loop body
LE: loop exit
PB: predicated region body
PF: predicated region fallthrough
CT: control target
= control target key end

     0   :  { %s399_s0 = inlined_call_operand.vmem [shape: f32[8,32], index: 0, kind: input, shape index: {}]   ;;  %s400_s1 = inlined_call_operand.vmem [shape: f32[16,32], index: 1, kind: input, shape index: {}]   ;;  %s401_s2 = inlined_call_operand.vmem [shape: f32[16,1], index: 2, kind: input, shape index: {}]   ;;  %s402_s3 = inlined_call_operand.vmem [shape: f32[16,1], index: 3, kind: input, shape index: {}]   ;;  %s403_s4 = inlined_call_operand.<no memory space> [shape: f32[1,1], index: 4, kind: input, shape index: {}]   ;;  %s404_s5 = inlined_call_operand.hbm [shape: f32[1,8], index: 5, kind: output, shape index: {}]  }
   0x1   :  { %v10_v0 = vstv %s403_s4 }
   0x2   :  { %11 = vst [vmem:[#allocation2] sm:$0x1] %v10_v0 }
   0x3   :  { %v25_v1 = vld [vmem:[%s399_s0] sm:$0xff]  ;;  %vm38_vm0 = vcmask 261120   ;;  %v24_v2 = vld [vmem:[%s400_s1 + $0x8] sm:$0xff]  ;;  %v340_v7 = vmov 0  }
   0x4   :  { %v23_v3 = vld [vmem:[%s400_s1] sm:$0xff]  ;;  %v46_v4 = vsel %vm38_vm0, %v25_v1, 0  ;;  %v43_v5 = vsel %vm38_vm0, %v24_v2, 0  ;;  %307 = vset.pattern.permute.xlu0 %v340_v7  ;;  %308 = vset.pattern.permute.xlu1 %v340_v7 }
   0x5   :  { %v40_v6 = vsel %vm38_vm0, %v23_v3, 0  ;;  %v26_v8 = vld [vmem:[%s401_s2] sm:$0xff]  ;;  %v63_v10 = vand.u32 4294901760, %v46_v4  ;;  %v73_v11 = vand.u32 4294901760, %v43_v5  ;;  %309 = vset.pattern.permute.xlu2 %v340_v7 }
   0x6   :  { %v227_v9 = vld [vmem:[%s402_s3] sm:$0xff]  ;;  %v65_v12 = vand.u32 4294901760, %v40_v6  ;;  %30 = vperm.xlu0 %307, %v26_v8  }
   0x7   :  { %231 = vperm.xlu1 %308, %v227_v9  }
   0x9   :  { %v251_v13 = vld [vmem:[#allocation2] sm:$0x1] }
   0xa   :  { %12 = vsyncpa [#allocation4], 0  ;;  %303 = vmatpush.xpose.msra.mxu2 %v63_v10  ;;  %v74_v14 = vsub.f32 %v43_v5, %v73_v11  ;;  %v98_v15 = vsub.f32 %v46_v4, %v63_v10  ;;  %64 = vmatpush.xpose.msra.mxu0 %v63_v10  ;;  %v66_v16 = vsub.f32 %v40_v6, %v65_v12  ;;  %v27_v20 = vld [vmem:[%s401_s2 + $0x8] sm:$0xff]  ;;  %vm241_vm1 = vcmask 64512   ;;  %s341_s2 = smov [#allocation3]   ;;  %s294_s8 = sshll.u32 %s404_s5, 4  ;;  %s295_s8 = int_to_ptr.hbm [resolvable:$true] %s294_s8 }
   0xb   :  { %254 = vperm.xlu2 %309, %v251_v13   ;;  %v228_v21 = vld [vmem:[%s402_s3 + $0x8] sm:$0xff]  ;;  %v278_v13 = vlaneseq  ;;  %s292_s3 = sshll.u32 %s341_s2, 4  ;;  %vm285_vm7 = vcmask 57344   ;;  %s293_s3 = int_to_ptr.vmem [resolvable:$true] %s292_s3 }
   0xc   :  { %v75_v17 = vand.u32 4294901760, %v74_v14  ;;  %v99_v18 = vand.u32 4294901760, %v98_v15  ;;  %v67_v19 = vand.u32 4294901760, %v66_v16 }
   0xe   :  { %129 = vmatpush.xpose.msrb.mxu2 %v98_v15  ;;  %v76_v22 = vsub.f32 %v74_v14, %v75_v17  ;;  %v100_v23 = vsub.f32 %v98_v15, %v99_v18  ;;  %v68_v24 = vsub.f32 %v66_v16, %v67_v19  ;;  %189 = vmatpush.xpose.msrb.mxu0 %v99_v18 }
   0xf   :  { %35 = vperm.xlu0 %307, %v27_v20   ;;  %236 = vperm.xlu1 %308, %v228_v21  }
  0x10   :  { %v77_v25 = vand.u32 4294901760, %v76_v22  ;;  %v101_v26 = vand.u32 4294901760, %v100_v23  ;;  %v69_v27 = vand.u32 4294901760, %v68_v24 }
  0x12   :  { %78 = vmatmul.f32.vlgmr.msra.gmra.mxu2 %v77_v25  ;;  %304 = vmatpush.xpose.msra.mxu3 %v101_v26 }
  0x13   :  { %102 = vmatpush.xpose.msra.mxu1 %v101_v26  ;;  %70 = vmatmul.f32.vlgmr.msra.gmra.mxu0 %v69_v27 }
  0x15   :  { %108 = vmatmul.f32.vlgmr.msra.gmra.mxu3 %v73_v11 }
  0x16   :  { %157 = vmatpush.xpose.msrb.mxu3 %v63_v10  ;;  %104 = vmatmul.f32.vlgmr.msra.gmra.mxu1 %v65_v12 }
  0x17   :  { %215 = vmatpush.xpose.msrb.mxu1 %v63_v10 }
  0x1a   :  { %132 = vmatmul.f32.vlgmr.msrb.gmra.mxu2 %v66_v16 }
  0x1b   :  { %191 = vmatmul.f32.vlgmr.msrb.gmra.mxu0 %v65_v12 }
  0x1d   :  { %161 = vmatmul.f32.vlgmr.msrb.gmra.mxu3 %v67_v19 }
  0x1e   :  { %217 = vmatmul.f32.vlgmr.msrb.gmra.mxu1 %v65_v12 }
  0x22   :  { %137 = vmatmul.f32.gmra.mxu2 %v74_v14 }
  0x23   :  { %195 = vmatmul.f32.gmra.mxu0 %v73_v11 }
  0x25   :  { %167 = vmatmul.f32.gmra.mxu3 %v75_v17  ;;  %v279_v17 = vand.u32 127, %v278_v13 }
  0x26   :  { %221 = vmatmul.f32.gmra.mxu1 %v73_v11 }
  0x27   :  { %vm283_vm5 = vcmp.lt.s32.totalorder %v279_v17, 8 }
  0x65   :  { %v255_v2 = vpop.permute.xlu2 %254 }
  0x66   :  { %v257_v5 = vperm.slane %v255_v2, 0 }
  0x78   :  { %v31_v28 = vpop.permute.xlu0 %30 }
  0x79   :  { %v232_v46 = vpop.permute.xlu1 %231 }
  0x81   :  { %v36_v35 = vpop.permute.xlu0 %35  ;;  %v237_v58 = vpop.permute.xlu1 %236 }
  0x90   :  { %v71_v29 = vpop.f32.mrf.mxu0 }
  0x91   :  { %v72_v31 = vadd.f32 %v71_v29, %v31_v28 }
  0x93   :  { %v105_v32 = vpop.f32.mrf.mxu1 }
  0x94   :  { %v106_v34 = vadd.f32 %v105_v32, %v72_v31 }
  0x95   :  { %v79_v30 = vpop.f32.mrf.mxu2 }
  0x96   :  { %v80_v39 = vadd.f32 %v79_v30, %v36_v35 }
  0x98   :  { %v109_v33 = vpop.f32.mrf.mxu3  ;;  %v192_v38 = vpop.f32.mrf.mxu0 }
  0x99   :  { %v110_v44 = vadd.f32 %v109_v33, %v80_v39 }
  0x9b   :  { %v218_v41 = vpop.f32.mrf.mxu1 }
  0x9d   :  { %v133_v36 = vpop.f32.mrf.mxu2 }
  0x9e   :  { %v134_v37 = vadd.f32 %v133_v36, %v106_v34 }
  0xa0   :  { %v162_v40 = vpop.f32.mrf.mxu3  ;;  %v196_v50 = vpop.f32.mrf.mxu0 }
  0xa1   :  { %v163_v42 = vadd.f32 %v162_v40, %v134_v37 }
  0xa3   :  { %v193_v43 = vadd.f32 %v192_v38, %v163_v42  ;;  %v222_v52 = vpop.f32.mrf.mxu1 }
  0xa5   :  { %v138_v45 = vpop.f32.mrf.mxu2  ;;  %v219_v48 = vadd.f32 %v218_v41, %v193_v43 }
  0xa6   :  { %v139_v47 = vadd.f32 %v138_v45, %v110_v44 }
  0xa7   :  { %v225_v53 = vmax.f32 %v219_v48, 0.0 }
  0xa8   :  { %v168_v49 = vpop.f32.mrf.mxu3 }
  0xa9   :  { %v169_v51 = vadd.f32 %v168_v49, %v139_v47  ;;  %v239_v56 = vmul.f32 %v232_v46, %v225_v53 }
  0xab   :  { %v197_v54 = vadd.f32 %v196_v50, %v169_v51  ;;  %v242_v60 = vsel %vm241_vm1, %v239_v56, 0.0 }
  0xad   :  { %v223_v55 = vadd.f32 %v222_v52, %v197_v54 }
  0xaf   :  { %v226_v57 = vmax.f32 %v223_v55, 0.0 }
  0xb1   :  { %v240_v59 = vmul.f32 %v237_v58, %v226_v57 }
  0xb3   :  { %v243_v61 = vsel %vm241_vm1, %v240_v59, 0.0 }
  0xb4   :  { %v244_v62 = vadd.f32 %v243_v61, %v242_v60 }
  0xb6   :  { %v245_v63 = vrot.slane %v244_v62, 4 }
  0xb8   :  { %v246_v0 = vadd.f32 %v245_v63, %v244_v62 }
  0xba   :  { %v247_v1 = vrot.slane %v246_v0, 2 }
  0xbc   :  { %v248_v3 = vadd.f32 %v247_v1, %v246_v0 }
  0xbe   :  { %v249_v4 = vrot.slane %v248_v3, 1 }
  0xc0   :  { %v250_v6 = vadd.f32 %v249_v4, %v248_v3 }
  0xc2   :  { %v258_v7 = vadd.f32 %v257_v5, %v250_v6 }
  0xc4   :  { %v259_v8 = vsub.f32 0.0, %v258_v7 }
  0xc6   :  { %v260_v9 = vmul.f32 1.442695, %v259_v8 }
  0xc8   :  { %310 = vpow2.f32 %v260_v9 }
  0xce   :  { %v311_v10 = vpop.eup %310 }
  0xcf   :  { %v262_v11 = vadd.f32 1.0, %v311_v10 }
  0xd1   :  { %312 = vrcp.f32 %v262_v11  ;;  %v274_v16 = vand.u32 2147483648, %v262_v11  ;;  %v272_v19 = vand.u32 2147483647, %v262_v11  ;;  %vm268_vm3 = vweird.f32 %v262_v11 }
  0xd3   :  { %v275_v21 = vor.u32 1.1754944e-38, %v274_v16  ;;  %vm273_vm6 = vcmp.eq.f32.partialorder %v272_v19, 8.507059e+37 }
  0xd7   :  { %v313_v12 = vpop.eup %312 }
  0xd8   :  { %v264_v14 = vmul.f32 %v313_v12, %v262_v11  ;;  %vm269_vm2 = vweird.f32 %v313_v12 }
  0xd9   :  { %vm270_vm4 = vmor %vm268_vm3, %vm269_vm2 }
  0xda   :  { %v265_v15 = vsub.f32 1.0, %v264_v14 }
  0xdc   :  { %v266_v18 = vmul.f32 %v313_v12, %v265_v15 }
  0xde   :  { %v267_v20 = vadd.f32 %v313_v12, %v266_v18 }
  0xe0   :  { %v271_v22 = vsel %vm270_vm4, %v313_v12, %v267_v20 }
  0xe1   :  { %v276_v23 = vsel %vm273_vm6, %v275_v21, %v271_v22 }
  0xe2   :  { %v284_v24 = vsel %vm283_vm5, %v276_v23, 0.0 }
  0xe3   :  { %286 = vst.msk [vmem:[#allocation3] sm:$0x1] %vm285_vm7, %v284_v24 }
  0xe4   :  { %297 = dma.vmem_to_hbm [thread:$0]  %s293_s3, 16, %s295_s8, [#allocation4]  }
  0xe5   :  { %338 = dma.done.wait [#allocation4], 16  }
  0xe6   :  { %339 = vsyncadd [#allocation4], 4294967280 }
  0xe7   :  { %302 = vsyncpa [#allocation4], 1 }

</bundles_post_ra>
